<compile_context>
chip_gen: v6e
topology: v6e:2x2x1
jax: 0.10.0
libtpu: 0.0.40
codegen_flags: <defaults>
</compile_context>

<pallas_src>
import jax
import jax.numpy as jnp
from jax.experimental import pallas as pl
from jax.experimental.pallas import tpu as pltpu


def _translate_kernel(p_ref, x_ref, o_ref):
    """Bilinear sub-pixel translation of one (C, H, W) image.

    p_ref: (1, 4) f32 = [floor(dy), floor(dx), frac(dy), frac(dx)]
    x_ref / o_ref: (C, H, W) image block (batch dim squeezed by BlockSpec).
    """
    c, h, w = x_ref.shape
    y0 = p_ref[0, 0].astype(jnp.int32)   # integer part of the row shift
    x0 = p_ref[0, 1].astype(jnp.int32)   # integer part of the col shift
    fy = p_ref[0, 2]                     # fractional row weight
    fx = p_ref[0, 3]                     # fractional col weight

    img = x_ref[...].astype(jnp.float32)                      # (C, H, W)

    # Horizontal pass: tmp[c,i,j] = (1-fx)*img[c,i,j+x0] + fx*img[c,i,j+x0+1]
    # expressed as img @ SxT with SxT[w, j] = (1-fx)*[w-j==x0] + fx*[w-j==x0+1]
    w_src = jax.lax.broadcasted_iota(jnp.int32, (c, w, w), 1)
    j_out = jax.lax.broadcasted_iota(jnp.int32, (c, w, w), 2)
    dwj = w_src - j_out
    sxt = (jnp.where(dwj == x0, 1.0 - fx, 0.0)
           + jnp.where(dwj == x0 + 1, fx, 0.0))                # (C, W, W)
    tmp = jax.lax.dot_general(
        img, sxt,
        dimension_numbers=(((2,), (1,)), ((0,), (0,))),
        preferred_element_type=jnp.float32)                     # (C, H, W)

    # Vertical pass: out[c,i,j] = (1-fy)*tmp[c,i+y0,j] + fy*tmp[c,i+y0+1,j]
    # expressed as Sy @ tmp with Sy[i, hh] = (1-fy)*[hh-i==y0] + fy*[hh-i==y0+1]
    i_out = jax.lax.broadcasted_iota(jnp.int32, (c, h, h), 1)
    h_src = jax.lax.broadcasted_iota(jnp.int32, (c, h, h), 2)
    dhi = h_src - i_out
    sy = (jnp.where(dhi == y0, 1.0 - fy, 0.0)
          + jnp.where(dhi == y0 + 1, fy, 0.0))                  # (C, H, H)
    out = jax.lax.dot_general(
        sy, tmp,
        dimension_numbers=(((2,), (1,)), ((0,), (0,))),
        preferred_element_type=jnp.float32)                     # (C, H, W)

    o_ref[...] = out.astype(o_ref.dtype)


def translate_images(x, tx, ty):
    """Translate each image n by (tx[n], ty[n]) in normalized affine_grid
    coordinates (align_corners=False), bilinear, zero padding — the exact
    reduction of affine_grid + grid_sample for a pure-translation theta."""
    x = jnp.asarray(x)
    n, c, h, w = x.shape

    dy = jnp.asarray(ty, jnp.float32) * (h / 2.0)   # shift in pixels (rows)
    dx = jnp.asarray(tx, jnp.float32) * (w / 2.0)   # shift in pixels (cols)
    y0 = jnp.floor(dy)
    x0 = jnp.floor(dx)
    params = jnp.stack([y0, x0, dy - y0, dx - x0], axis=-1)     # (N, 4)
    params = params.reshape(n, 1, 4).astype(jnp.float32)        # (N, 1, 4)

    return pl.pallas_call(
        _translate_kernel,
        out_shape=jax.ShapeDtypeStruct((n, c, h, w), x.dtype),
        grid_spec=pltpu.PrefetchScalarGridSpec(
            num_scalar_prefetch=0,
            grid=(n,),
            in_specs=[
                pl.BlockSpec((None, 1, 4), lambda i: (i, 0, 0)),
                pl.BlockSpec((None, c, h, w), lambda i: (i, 0, 0, 0)),
            ],
            out_specs=pl.BlockSpec((None, c, h, w), lambda i: (i, 0, 0, 0)),
        ),
        compiler_params=pltpu.CompilerParams(
            dimension_semantics=("parallel",)),
    )(params, x)


def random_translation(x, key, augment_translation=10):
    """Pallas-backed equivalent of the PyTorch RandomTranslation module."""
    x = jnp.asarray(x)
    n, _, _, w = x.shape
    t_min = -augment_translation / w
    t_max = (augment_translation + 1) / w
    k1, k2 = jax.random.split(key)
    tx = (t_min - t_max) * jax.random.uniform(k1, (n,), jnp.float32) + t_max
    ty = (t_min - t_max) * jax.random.uniform(k2, (n,), jnp.float32) + t_max
    return translate_images(x, tx, ty)


def _reference_translate(x, tx, ty):
    """Pure-JAX reference: direct bilinear grid_sample (zeros padding,
    align_corners=False) for a per-image translation."""
    x = jnp.asarray(x, jnp.float32)
    n, c, h, w = x.shape
    dy = jnp.asarray(ty, jnp.float32) * (h / 2.0)
    dx = jnp.asarray(tx, jnp.float32) * (w / 2.0)

    def one_image(img, dyi, dxi):
        iy = jnp.arange(h, dtype=jnp.float32) + dyi          # (H,)
        ix = jnp.arange(w, dtype=jnp.float32) + dxi          # (W,)
        y0 = jnp.floor(iy).astype(jnp.int32)
        x0 = jnp.floor(ix).astype(jnp.int32)
        wy1 = iy - y0.astype(jnp.float32)
        wy0 = 1.0 - wy1
        wx1 = ix - x0.astype(jnp.float32)
        wx0 = 1.0 - wx1

        def pick(yi, xi):
            valid = (((yi >= 0) & (yi < h))[:, None]
                     & ((xi >= 0) & (xi < w))[None, :])       # (H, W)
            yc = jnp.clip(yi, 0, h - 1)
            xc = jnp.clip(xi, 0, w - 1)
            v = img[:, yc, :][:, :, xc]                       # (C, H, W)
            return jnp.where(valid[None], v, 0.0)

        return (wy0[:, None] * wx0[None, :] * pick(y0, x0)
                + wy0[:, None] * wx1[None, :] * pick(y0, x0 + 1)
                + wy1[:, None] * wx0[None, :] * pick(y0 + 1, x0)
                + wy1[:, None] * wx1[None, :] * pick(y0 + 1, x0 + 1))

    return jax.vmap(one_image)(x, dy, dx)


if __name__ == "__main__":
    key = jax.random.PRNGKey(0)
    k_img, k_t = jax.random.split(key)

    N, C, H, W = 2, 4, 16, 16
    x = jax.random.normal(k_img, (N, C, H, W), dtype=jnp.float32)

    # Sample translations exactly the way the module does (but with jax.random)
    # so the kernel can be checked against an independent reference.
    aug = 10
    t_min = -aug / W
    t_max = (aug + 1) / W
    k1, k2 = jax.random.split(k_t)
    tx = (t_min - t_max) * jax.random.uniform(k1, (N,), jnp.float32) + t_max
    ty = (t_min - t_max) * jax.random.uniform(k2, (N,), jnp.float32) + t_max

    out = translate_images(x, tx, ty)
    out = jax.block_until_ready(out)

    ref = _reference_translate(x, tx, ty)
    assert out.shape == x.shape and out.dtype == x.dtype
    assert jnp.allclose(out, ref, rtol=2e-2, atol=2e-2), \
        float(jnp.max(jnp.abs(out - ref)))

    # Exercise the full module-equivalent entry point (sampling included).
    out2 = jax.block_until_ready(random_translation(x, k_t,
                                                    augment_translation=10))
    assert out2.shape == x.shape

    print("KERNEL_OK")
</pallas_src>

<mosaic_0001>
module attributes {stable_mosaic.version = 11 : i64} {
  func.func @_translate_kernel(%arg0: i32, %arg1: memref<1x1x4xf32, #tpu.memory_space<vmem>>, %arg2: memref<1x4x16x16xf32, #tpu.memory_space<vmem>>, %arg3: memref<1x4x16x16xf32, #tpu.memory_space<vmem>>) attributes {dimension_semantics = [#tpu.dimension_semantics<parallel>], iteration_bounds = array<i64: 2>, scalar_prefetch = 0 : i64, scratch_operands = 0 : i64, tpu.core_type = #tpu.core_type<tc>, window_params = [{transform_indices = @transform_0, window_bounds = array<i64: 1, 1, 4>}, {transform_indices = @transform_1, window_bounds = array<i64: 1, 4, 16, 16>}, {transform_indices = @transform_2, window_bounds = array<i64: 1, 4, 16, 16>}]} {
    %c0 = arith.constant 0 : index
    %c0_0 = arith.constant 0 : index
    %c0_1 = arith.constant 0 : index
    %0 = vector.load %arg1[%c0, %c0_0, %c0_1] : memref<1x1x4xf32, #tpu.memory_space<vmem>>, vector<1x1x1xf32>
    %1 = vector.extract %0[0, 0, 0] : f32 from vector<1x1x1xf32>
    %2 = arith.fptosi %1 : f32 to i32
    %c0_2 = arith.constant 0 : index
    %c0_3 = arith.constant 0 : index
    %c1 = arith.constant 1 : index
    %3 = vector.load %arg1[%c0_2, %c0_3, %c1] : memref<1x1x4xf32, #tpu.memory_space<vmem>>, vector<1x1x1xf32>
    %4 = vector.extract %3[0, 0, 0] : f32 from vector<1x1x1xf32>
    %5 = arith.fptosi %4 : f32 to i32
    %c0_4 = arith.constant 0 : index
    %c0_5 = arith.constant 0 : index
    %c2 = arith.constant 2 : index
    %6 = vector.load %arg1[%c0_4, %c0_5, %c2] : memref<1x1x4xf32, #tpu.memory_space<vmem>>, vector<1x1x1xf32>
    %7 = vector.extract %6[0, 0, 0] : f32 from vector<1x1x1xf32>
    %c0_6 = arith.constant 0 : index
    %c0_7 = arith.constant 0 : index
    %c3 = arith.constant 3 : index
    %8 = vector.load %arg1[%c0_6, %c0_7, %c3] : memref<1x1x4xf32, #tpu.memory_space<vmem>>, vector<1x1x1xf32>
    %9 = vector.extract %8[0, 0, 0] : f32 from vector<1x1x1xf32>
    %c0_8 = arith.constant 0 : index
    %c0_9 = arith.constant 0 : index
    %c0_10 = arith.constant 0 : index
    %c0_11 = arith.constant 0 : index
    %10 = vector.load %arg2[%c0_8, %c0_9, %c0_10, %c0_11] : memref<1x4x16x16xf32, #tpu.memory_space<vmem>>, vector<1x4x16x16xf32>
    %11 = vector.shape_cast %10 : vector<1x4x16x16xf32> to vector<4x16x16xf32>
    %12 = tpu.iota {dimensions = array<i32: 1>} : vector<4x16x16xi32>
    %13 = tpu.iota {dimensions = array<i32: 2>} : vector<4x16x16xi32>
    %14 = arith.subi %12, %13 : vector<4x16x16xi32>
    %15 = vector.broadcast %5 : i32 to vector<4x16x16xi32>
    %16 = arith.cmpi eq, %14, %15 : vector<4x16x16xi32>
    %cst = arith.constant 1.000000e+00 : f32
    %17 = arith.subf %cst, %9 : f32
    %cst_12 = arith.constant 0.000000e+00 : f32
    %18 = vector.broadcast %17 : f32 to vector<4x16x16xf32>
    %19 = vector.broadcast %cst_12 : f32 to vector<4x16x16xf32>
    %20 = arith.select %16, %18, %19 : vector<4x16x16xi1>, vector<4x16x16xf32>
    %c1_i32 = arith.constant 1 : i32
    %21 = arith.addi %5, %c1_i32 : i32
    %22 = vector.broadcast %21 : i32 to vector<4x16x16xi32>
    %23 = arith.cmpi eq, %14, %22 : vector<4x16x16xi32>
    %cst_13 = arith.constant 0.000000e+00 : f32
    %24 = vector.broadcast %9 : f32 to vector<4x16x16xf32>
    %25 = vector.broadcast %cst_13 : f32 to vector<4x16x16xf32>
    %26 = arith.select %23, %24, %25 : vector<4x16x16xi1>, vector<4x16x16xf32>
    %27 = arith.addf %20, %26 : vector<4x16x16xf32>
    %cst_14 = arith.constant dense<0.000000e+00> : vector<4x16x16xf32>
    %28 = tpu.matmul %11, %27, %cst_14 {dimension_numbers = #tpu.dot_dimension_numbers<[2], [1], [1], [2], [0, 0, 0, 1, 1, 2], [0], [0]>} : vector<4x16x16xf32>, vector<4x16x16xf32>, vector<4x16x16xf32> -> vector<4x16x16xf32>
    %29 = tpu.iota {dimensions = array<i32: 1>} : vector<4x16x16xi32>
    %30 = tpu.iota {dimensions = array<i32: 2>} : vector<4x16x16xi32>
    %31 = arith.subi %30, %29 : vector<4x16x16xi32>
    %32 = vector.broadcast %2 : i32 to vector<4x16x16xi32>
    %33 = arith.cmpi eq, %31, %32 : vector<4x16x16xi32>
    %cst_15 = arith.constant 1.000000e+00 : f32
    %34 = arith.subf %cst_15, %7 : f32
    %cst_16 = arith.constant 0.000000e+00 : f32
    %35 = vector.broadcast %34 : f32 to vector<4x16x16xf32>
    %36 = vector.broadcast %cst_16 : f32 to vector<4x16x16xf32>
    %37 = arith.select %33, %35, %36 : vector<4x16x16xi1>, vector<4x16x16xf32>
    %c1_i32_17 = arith.constant 1 : i32
    %38 = arith.addi %2, %c1_i32_17 : i32
    %39 = vector.broadcast %38 : i32 to vector<4x16x16xi32>
    %40 = arith.cmpi eq, %31, %39 : vector<4x16x16xi32>
    %cst_18 = arith.constant 0.000000e+00 : f32
    %41 = vector.broadcast %7 : f32 to vector<4x16x16xf32>
    %42 = vector.broadcast %cst_18 : f32 to vector<4x16x16xf32>
    %43 = arith.select %40, %41, %42 : vector<4x16x16xi1>, vector<4x16x16xf32>
    %44 = arith.addf %37, %43 : vector<4x16x16xf32>
    %cst_19 = arith.constant dense<0.000000e+00> : vector<4x16x16xf32>
    %45 = tpu.matmul %44, %28, %cst_19 {dimension_numbers = #tpu.dot_dimension_numbers<[2], [1], [1], [2], [0, 0, 0, 1, 1, 2], [0], [0]>} : vector<4x16x16xf32>, vector<4x16x16xf32>, vector<4x16x16xf32> -> vector<4x16x16xf32>
    %c0_20 = arith.constant 0 : index
    %c0_21 = arith.constant 0 : index
    %c0_22 = arith.constant 0 : index
    %c0_23 = arith.constant 0 : index
    %46 = vector.load %arg3[%c0_20, %c0_21, %c0_22, %c0_23] : memref<1x4x16x16xf32, #tpu.memory_space<vmem>>, vector<1x4x16x16xf32>
    %47 = vector.shape_cast %46 : vector<1x4x16x16xf32> to vector<4x16x16xf32>
    %48 = vector.shape_cast %45 : vector<4x16x16xf32> to vector<1x4x16x16xf32>
    tpu.vector_store %arg3[%c0_20, %c0_21, %c0_22, %c0_23], %48 {strides = array<i32>} : memref<1x4x16x16xf32, #tpu.memory_space<vmem>>, vector<1x4x16x16xf32>,
    return
  }
  func.func @transform_0(%arg0: i32) -> (i32, i32, i32) {
    %c0_i32 = arith.constant 0 : i32
    %c0_i32_0 = arith.constant 0 : i32
    %c0_i32_1 = arith.constant 0 : i32
    return %arg0, %c0_i32, %c0_i32_0 : i32, i32, i32
  }
  func.func @transform_1(%arg0: i32) -> (i32, i32, i32, i32) {
    %c0_i32 = arith.constant 0 : i32
    %c0_i32_0 = arith.constant 0 : i32
    %c0_i32_1 = arith.constant 0 : i32
    %c0_i32_2 = arith.constant 0 : i32
    return %arg0, %c0_i32, %c0_i32_0, %c0_i32_1 : i32, i32, i32, i32
  }
  func.func @transform_2(%arg0: i32) -> (i32, i32, i32, i32) {
    %c0_i32 = arith.constant 0 : i32
    %c0_i32_0 = arith.constant 0 : i32
    %c0_i32_1 = arith.constant 0 : i32
    %c0_i32_2 = arith.constant 0 : i32
    return %arg0, %c0_i32, %c0_i32_0, %c0_i32_1 : i32, i32, i32, i32
  }
}

</mosaic_0001>

<bundles_post_ra>
// kernel: tpu_custom_call.1
= control target key start
LH: loop header
LB: loop body
LE: loop exit
PB: predicated region body
PF: predicated region fallthrough
CT: control target
= control target key end

     0   :  { %7 = vsyncpa [#allocation3], 0  ;;  %s1625_s0 = inlined_call_operand.hbm [shape: f32[2,1,4], index: 0, kind: input, shape index: {}]   ;;  %s1626_s1 = inlined_call_operand.hbm [shape: f32[2,4,16,16], index: 1, kind: input, shape index: {}]   ;;  %s1627_s2 = inlined_call_operand.hbm [shape: f32[2,4,16,16], index: 2, kind: output, shape index: {}]  }
   0x1   :  { %9 = vsyncpa [#allocation3 + $0x1], 0 }
   0x2   :  { %10 = vsyncpa [#allocation6], 0 }
   0x3   :  { %12 = vsyncpa [#allocation6 + $0x1], 0 }
   0x4   :  { %13 = vsyncpa [#allocation4], 0 }
   0x5   :  { %15 = vsyncpa [#allocation4 + $0x1], 0  ;;  %s1356_s9 = smov 0   ;;  %s1358_s10 = smov 0  }
   0x6   :  { %s1360_s11 = smov 0   ;;  %s1362_s12 = smov 0  }
   0x7 LB: > { %s1377_s13 = sadd.s32 4294967295, %s1329_s12   ;;  %s1008_s14 = sadd.s32 4294967294, %s1329_s12   ;;  %s1329_s12 = sphi %s1362_s12, %s1647_s12   ;;  %s1325_s11 = sphi %s1360_s11, %s1646_s11   ;;  %s1321_s10 = sphi %s1358_s10, %s1645_s10   ;;  %s1317_s9 = sphi %s1356_s9, %s1644_s9  }
   0x8   : > { %s1381_s15 = sadd.s32 1, %s1329_s12   ;;  %s28_s16 = sadd.s32 1, %s1325_s11 }
   0x9   : > { %s25_s17 = ssub.s32 %s1329_s12, %s1381_s15  ;;  %p35_p0 = scmp.ne.s32.totalorder %s1325_s11, %s1321_s10 }
   0xa   : > { %p26_p1 = scmp.eq.s32.totalorder %s25_s17, 0  ;;  %p36_p2 = scmp.eq.s32.totalorder %s1329_s12, 0 }
   0xb   : > { %p41_p3 = scmp.ne.s32.totalorder %s1321_s10, %s1317_s9  ;;  %p42_p4 = scmp.eq.s32.totalorder %s1377_s13, 0 }
   0xc   : > { %s1393_s18 = scalar_select %p26_p1, %s1325_s11, %s28_s16  }
   0xd   : > { %p1395_p5 = por %p36_p2, %p35_p0  ;;  %p1399_p6 = por %p42_p4, %p41_p3 }
   0xe   : > { %p91_p7 = scmp.eq.s32.totalorder %s1377_s13, 1  ;;  %p97_p8 = scmp.eq.s32.totalorder %s1008_s14, 1 }
   0xf   : > { %s1631_s20 = scalar_select %p1399_p6, 1, 0 }
  0x10   : > { %p1164_p10 = scmp.lt.s32.totalorder %s1329_s12, 2  ;;  %p1406_p11 = por %p91_p7, %p35_p0 }
  0x11   : > { %p1410_p12 = por %p97_p8, %p41_p3  ;;  %s1415_s23 = sand.u32 1, %s1325_s11  }
  0x12   : > { %s1632_s21 = scalar_select %p1406_p11, 1, 0 }
  0x13   : > { %s1633_s22 = scalar_select %p1410_p12, 1, 0 }
  0x14   : > { %s1011_s24 = sshll.u32 %s1329_s12, 4  ;;  %s120_s28 = scalar_lea.vmem [#allocation2], %s1415_s23 }
  0x15   : > { %s1421_s27 = scalar_lea.hbm %s1625_s0, %s1011_s24  ;;  %s127_s29 = sshll.u32 %s120_s28, 4  ;;  %s1424_s29 = int_to_ptr.vmem [resolvable:$true] %s127_s29 }
  0x16   : > { %p1428_p13 = pnand %p1164_p10, %p1395_p5  ;;  %s118_s3 = scalar_lea.sflag [#allocation3], %s1415_s23 }
  0x17   : > { %s1205_s4 = scalar_lea.hbm %s1421_s27, 16  ;;  %s1210_s7 = scalar_lea.hbm %s1625_s0, 32 }
  0x18   : > { %p1206_p2 = scmp.ne.s32.totalorder %s1421_s27, %s1205_s4  ;;  %p1207_p3 = pneg %p1428_p13 }
  0x19   : > { %p1211_p5 = scmp.lt.s32.totalorder %s1421_s27, %s1625_s0  ;;  %p1212_p8 = scmp.lt.s32.totalorder %s1210_s7, %s1205_s4 }
  0x1a   : > { %p1208_p4 = pnand %p1207_p3, %p1206_p2 }
  0x1b   : > { %p1213_p10 = por %p1212_p8, %p1211_p5 }
  0x1c   : > { %p1209_p7 = pneg %p1208_p4 }
  0x1e   : > { %p1214_p9 = pnand %p1213_p10, %p1209_p7 }
  0x20   : > { %1217 = shalt.err (!%p1214_p9)
}
  0x21   : > { %s1218_s16 = scalar_lea.vmem %s1424_s29, 16  ;;  %s1331_s17 = smov [#allocation2]  }
  0x22   : > { %p1219_p0 = scmp.ne.s32.totalorder %s1424_s29, %s1218_s16  ;;  %s1223_s19 = sshll.u32 %s1331_s17, 4  ;;  %s1224_s19 = int_to_ptr.vmem [resolvable:$false] %s1223_s19 }
  0x23   : > { %s1225_s24 = scalar_lea.vmem %s1224_s19, 32  ;;  %p1226_p1 = scmp.lt.s32.totalorder %s1424_s29, %s1224_s19 }
  0x24   : > { %p1221_p2 = pnand %p1219_p0, %p1207_p3  ;;  %p1227_p12 = scmp.lt.s32.totalorder %s1225_s24, %s1218_s16 }
  0x26   : > { %p1222_p4 = pneg %p1221_p2  ;;  %p1228_p11 = por %p1227_p12, %p1226_p1 }
  0x28   : > { %p1229_p5 = pnand %p1228_p11, %p1222_p4 }
  0x2a   : > { %1232 = shalt.err (!%p1229_p5)
}
  0x2b   : > { %1156 = dma.hbm_to_vmem [thread:$0]  (!%p1428_p13), %s1421_s27, 16, %s1424_s29, %s118_s3  }
  0x2c   : > { %p1635_p9 = scmp.lt.s32.totalorder %s1329_s12, 3  ;;  %p1636_p0 = scmp.ge.s32.totalorder %s1329_s12, 1 }
  0x2d   : > { %s1012_s26 = sshll.u32 %s1415_s23, 6  ;;  %s1039_s28 = sshll.u32 %s1329_s12, 10 }
  0x2e   : > { %p1463_p7 = pnand %p1636_p0, %p1635_p9  ;;  %s1472_s6 = scalar_lea.hbm %s1626_s1, %s1039_s28 }
  0x2f   : > { %s138_s7 = scalar_lea.vmem [#allocation5], %s1012_s26  ;;  %s135_s27 = scalar_lea.sflag [#allocation6], %s1415_s23 }
  0x30   : > { %s145_s8 = sshll.u32 %s138_s7, 4  ;;  %s1233_s29 = scalar_lea.hbm %s1472_s6, 1024  ;;  %s1474_s8 = int_to_ptr.vmem [resolvable:$true] %s145_s8 }
  0x31   : > { %p1234_p11 = scmp.ne.s32.totalorder %s1472_s6, %s1233_s29  ;;  %s1238_s16 = scalar_lea.hbm %s1626_s1, 2048 }
  0x32   : > { %p1239_p8 = scmp.lt.s32.totalorder %s1472_s6, %s1626_s1  ;;  %p1240_p10 = scmp.lt.s32.totalorder %s1238_s16, %s1233_s29 }
  0x33   : > { %p1236_p12 = pnand %p1234_p11, %p1207_p3 }
  0x34   : > { %p1241_p2 = por %p1240_p10, %p1239_p8 }
  0x35   : > { %p1237_p1 = pneg %p1236_p12 }
  0x37   : > { %p1242_p4 = pnand %p1241_p2, %p1237_p1 }
  0x39   : > { %1245 = shalt.err (!%p1242_p4)
}
  0x3a   : > { %s1246_s24 = scalar_lea.vmem %s1474_s8, 1024  ;;  %s1332_s26 = smov [#allocation5]  }
  0x3b   : > { %p1247_p5 = scmp.ne.s32.totalorder %s1474_s8, %s1246_s24  ;;  %s1251_s28 = sshll.u32 %s1332_s26, 4  ;;  %s1252_s28 = int_to_ptr.vmem [resolvable:$false] %s1251_s28 }
  0x3c   : > { %s1253_s4 = scalar_lea.vmem %s1252_s28, 2048  ;;  %p1254_p11 = scmp.lt.s32.totalorder %s1474_s8, %s1252_s28 }
  0x3d   : > { %p1249_p9 = pnand %p1247_p5, %p1207_p3  ;;  %p1255_p12 = scmp.lt.s32.totalorder %s1253_s4, %s1246_s24 }
  0x3f   : > { %p1250_p0 = pneg %p1249_p9  ;;  %p1256_p6 = por %p1255_p12, %p1254_p11 }
  0x41   : > { %p1257_p8 = pnand %p1256_p6, %p1250_p0 }
  0x43   : > { %1260 = shalt.err (!%p1257_p8)
}
  0x44   : > { %s1333_s5 = smov 128   ;;  %s1334_s7 = smov 8  }
  0x45   : > { %1159 = dma.hbm_to_vmem [thread:$0]  (!%p1428_p13), %s1472_s6, 1024, %s1474_s8, %s135_s27, %s1333_s5, %s1333_s5, %s1334_s7  }
  0x46   : > { %157 = sbr.rel (%p1463_p7) target bundleno = 673 (0x2a1), region = 28  ;;  %s1504_s29 = sand.u32 (!%p1463_p7), 1, %s1321_s10  }
  0x47   : > { %s160_s3 = scalar_lea.sflag (!%p1463_p7), [#allocation3], %s1504_s29  ;;  %s162_s14 = scalar_lea.vmem (!%p1463_p7), [#allocation2], %s1504_s29 }
  0x48   : > { %p1638_p6 = scmp.ne.s32.totalorder (!%p1463_p7), %s1631_s20, 0 }
  0x4b   : > { %1304 = dma.done.wait (%p1638_p6), %s160_s3, 16  }
  0x4c   : > { %1306 = vsyncadd (%p1638_p6), %s160_s3, 4294967280  ;;  %s1016_s23 = sshll.u32 %s1504_s29, 6  ;;  %s168_s30 = scalar_lea.sflag [#allocation6], %s1504_s29 }
  0x4d   : > { %s1516_s25 = scalar_lea.vmem [#allocation5], %s1016_s23 }
  0x4e   : > { %1308 = dma.done.wait (%p1638_p6), %s168_s30, 1024  }
  0x4f   : > { %1310 = vsyncadd (%p1638_p6), %s168_s30, 4294966272  ;;  %v196_v0 = vld [vmem:[%s162_s14] sm:$0x1]  ;;  %s1335_s6 = smov 127   ;;  %s1336_s8 = smov 125   ;;  %v221_v1 = vlaneseq  ;;  %v213_v6 = vld [vmem:[%s1516_s25] sm:$0xff] }
  0x50   : > { %200 = vrot.lane.b32.xlu0 %v196_v0, %s1335_s6  ;;  %209 = vrot.lane.b32.xlu1 %v196_v0, %s1336_s8  ;;  %1129 = vpush %v196_v0  ;;  %s1337_s27 = smov 126   ;;  %vm244_vm0 = vcmask 130048   ;;  %v215_v7 = vld [vmem:[%s1516_s25 + $0x10] sm:$0xff]  ;;  %v214_v32 = vld [vmem:[%s1516_s25 + $0x8] sm:$0xff]  ;;  %p1641_p1 = scmp.ne.s32.totalorder %s1632_s21, 0 }
  0x51   : > { %v222_v2 = vshrl.u32 %v221_v1, 7  ;;  %v225_v4 = vand.u32 127, %v221_v1  ;;  %1077 = vmatprep.mubr.msk.f32.mxu0 %vm244_vm0, %v213_v6  ;;  %1084 = vmatprep.mubr.msk.f32.mxu1 %vm244_vm0, %v215_v7  ;;  %v216_v33 = vld [vmem:[%s1516_s25 + $0x18] sm:$0xff]  ;;  %v217_v34 = vld [vmem:[%s1516_s25 + $0x20] sm:$0xff]  ;;  %v219_v37 = vld [vmem:[%s1516_s25 + $0x30] sm:$0xff] }
  0x52   : > { %v218_v38 = vld [vmem:[%s1516_s25 + $0x28] sm:$0xff]  ;;  %v220_v39 = vld [vmem:[%s1516_s25 + $0x38] sm:$0xff]  ;;  %s195_s25 = scalar_lea.vmem [#allocation7], %s1016_s23 }
  0x53   : > { %v223_v3 = vadd.s32 8, %v222_v2  ;;  %v226_v14 = vsub.s32 %v222_v2, %v225_v4  ;;  %v569_v30 = vsub.s32 %v225_v4, %v222_v2  ;;  %s915_s8 = sshll.u32 %s195_s25, 4  ;;  %s1573_s8 = int_to_ptr.vmem [resolvable:$true] %s915_s8 }
  0x54   : > { %205 = vrot.lane.b32.xlu0 %v196_v0, %s1337_s27  ;;  %s1040_s27 = sshll.u32 %s1377_s13, 10  ;;  %s902_s13 = scalar_lea.sflag [#allocation4], %s1504_s29 }
  0x55   : > { %v570_v5 = vsub.s32 %v225_v4, %v223_v3  ;;  %v227_v15 = vsub.s32 %v223_v3, %v225_v4 }
  0x81   : > { %s1130_s16 = spop %1129 }
  0x82   : > { %p1131_p13 = scmp.lt.s32.totalorder %s1130_s16, 0  ;;  %s1132_s17 = sceil.f32 %s1130_s16 }
  0x83   : > { %s1133_s20 = sfloor.f32 %s1130_s16 }
  0x84   : > { %s1649_s17 = smov (!%p1131_p13, %s1132_s17), %s1133_s20  ;;  %s1261_s20 = scalar_lea.vmem %s1573_s8, 1024 }
  0x85   : > { %s1135_s19 = scvt.f32.s32 %s1649_s17  ;;  %s1578_s17 = scalar_lea.hbm %s1627_s2, %s1040_s27 }
  0x86   : > { %p1262_p7 = scmp.ne.s32.totalorder %s1573_s8, %s1261_s20 }
  0x87   : > { %v571_v8 = vstv %s1135_s19  ;;  %s1526_s24 = sadd.s32 1, %s1135_s19  ;;  %s1338_s19 = smov [#allocation7]  }
  0x88   : > { %vm573_vm1 = vcmp.eq.s32.totalorder %v570_v5, %v571_v8  ;;  %v579_v9 = vstv %s1526_s24  ;;  %vm572_vm7 = vcmp.eq.s32.totalorder %v569_v30, %v571_v8  ;;  %p1263_p10 = pnand %p1262_p7, %p1641_p1  ;;  %s1265_s24 = sshll.u32 %s1338_s19, 4  ;;  %s1266_s24 = int_to_ptr.vmem [resolvable:$false] %s1265_s24 }
  0x89   : > { %vm1529_vm2 = vcmp.eq.s32.totalorder %v570_v5, %v579_v9  ;;  %vm580_vm8 = vcmp.eq.s32.totalorder %v569_v30, %v579_v9  ;;  %p1268_p4 = scmp.lt.s32.totalorder %s1573_s8, %s1266_s24 }
  0x8a   : > { %p1264_p2 = pneg %p1263_p10 }
  0xc2   : > { %v201_v11 = vpop.permute.xlu0 %200  ;;  %v210_v12 = vpop.permute.xlu1 %209 }
  0xc3   : > { %1136 = vpush %v201_v11 }
  0xc6   : > { %v206_v13 = vpop.permute.xlu0 %205 }
  0xc7   : > { %1143 = vpush %v206_v13 }
  0xc8   : > { %1145 = vpush %v210_v12 }
  0xf4   : > { %s1137_s26 = spop %1136 }
  0xf5   : > { %p1138_p3 = scmp.lt.s32.totalorder %s1137_s26, 0  ;;  %s1139_s28 = sceil.f32 %s1137_s26 }
  0xf6   : > { %s1140_s4 = sfloor.f32 %s1137_s26  ;;  %s1267_s26 = scalar_lea.vmem %s1266_s24, 2048 }
  0xf7   : > { %s1651_s28 = smov (!%p1138_p3, %s1139_s28), %s1140_s4  ;;  %p1269_p5 = scmp.lt.s32.totalorder %s1267_s26, %s1261_s20 }
  0xf8   : > { %s1533_s5 = spop %1143  ;;  %s1142_s3 = scvt.f32.s32 %s1651_s28 }
  0xf9   : > { %s574_s7 = ssub.f32 1.0, %s1533_s5  ;;  %v582_v16 = vstv %s1533_s5  ;;  %s1146_s14 = spop %1145 }
  0xfa   : > { %v584_v17 = vsel %vm1529_vm2, %v582_v16, 0.0  ;;  %v228_v19 = vstv %s1142_s3  ;;  %s231_s30 = ssub.f32 1.0, %s1146_s14  ;;  %s235_s6 = sadd.s32 1, %s1142_s3  ;;  %v239_v25 = vstv %s1146_s14  ;;  %v583_v36 = vsel %vm580_vm8, %v582_v16, 0.0 }
  0xfb   : > { %v575_v18 = vstv %s574_s7  ;;  %vm229_vm3 = vcmp.eq.s32.totalorder %v226_v14, %v228_v19  ;;  %vm230_vm4 = vcmp.eq.s32.totalorder %v227_v15, %v228_v19  ;;  %v236_v23 = vstv %s235_s6  ;;  %p1270_p9 = por %p1269_p5, %p1268_p4 }
  0xfc   : > { %v577_v20 = vsel %vm573_vm1, %v575_v18, 0.0  ;;  %v232_v22 = vstv %s231_s30  ;;  %vm237_vm5 = vcmp.eq.s32.totalorder %v226_v14, %v236_v23  ;;  %vm238_vm6 = vcmp.eq.s32.totalorder %v227_v15, %v236_v23 }
  0xfd   : > { %v1540_v21 = vadd.f32 %v584_v17, %v577_v20  ;;  %v234_v24 = vsel %vm230_vm4, %v232_v22, 0.0  ;;  %v233_v26 = vsel %vm229_vm3, %v232_v22, 0.0  ;;  %v240_v27 = vsel %vm237_vm5, %v239_v25, 0.0  ;;  %p1271_p0 = pnand %p1270_p9, %p1264_p2 }
  0xfe   : > { %v241_v28 = vsel %vm238_vm6, %v239_v25, 0.0  ;;  %v242_v31 = vadd.f32 %v240_v27, %v233_v26  ;;  %v576_v35 = vsel %vm572_vm7, %v575_v18, 0.0 }
  0xff   : > { %v243_v29 = vadd.f32 %v241_v28, %v234_v24  ;;  %v585_v40 = vadd.f32 %v583_v36, %v576_v35 }
 0x101   : > { %1073 = vmatprep.subr.mxu0 %v243_v29  ;;  %1080 = vmatprep.subr.mxu1 %v243_v29 }
 0x102   : > { %1074 = vmatpush3.msra.mxu0 %v243_v29  ;;  %1081 = vmatpush3.msra.mxu1 %v243_v29 }
 0x103   : > { %1075 = vmatprep.subr.mxu0 %v242_v31  ;;  %1082 = vmatprep.subr.mxu1 %v242_v31 }
 0x104   : > { %1076 = vmatpush3.msra.mxu0 %v242_v31  ;;  %1083 = vmatpush3.msra.mxu1 %v242_v31 }
 0x105   : > { %1078 = vmatmul.mubr.msk.f32.vlgmr.msra.gmra.mxu0 %vm244_vm0, %v214_v32  ;;  %1085 = vmatmul.mubr.msk.f32.vlgmr.msra.gmra.mxu1 %vm244_vm0, %v216_v33 }
 0x106   : > { %1087 = vmatprep.subr.mxu0 %v243_v29  ;;  %1094 = vmatprep.subr.mxu1 %v243_v29 }
 0x107   : > { %1088 = vmatpush3.msra.mxu0 %v243_v29  ;;  %1095 = vmatpush3.msra.mxu1 %v243_v29 }
 0x108   : > { %1089 = vmatprep.subr.mxu0 %v242_v31  ;;  %1096 = vmatprep.subr.mxu1 %v242_v31 }
 0x109   : > { %1090 = vmatpush3.msra.mxu0 %v242_v31  ;;  %1091 = vmatprep.mubr.msk.f32.mxu0 %vm244_vm0, %v217_v34 }
 0x10a   : > { %1097 = vmatpush3.msra.mxu1 %v242_v31  ;;  %1098 = vmatprep.mubr.msk.f32.mxu1 %vm244_vm0, %v219_v37 }
 0x10b   : > { %1092 = vmatmul.mubr.msk.f32.vlgmr.msra.gmra.mxu0 %vm244_vm0, %v218_v38  ;;  %1099 = vmatmul.mubr.msk.f32.vlgmr.msra.gmra.mxu1 %vm244_vm0, %v220_v39 }
 0x10c   : > { %1105 = vmatprep.mubr.msk.f32.mxu0 %vm244_vm0, %v585_v40  ;;  %1112 = vmatprep.mubr.msk.f32.mxu1 %vm244_vm0, %v585_v40 }
 0x1c5   : > { %v1079_v41 = vpop.f32.mrf.mxu0  ;;  %v1086_v42 = vpop.f32.mrf.mxu1 }
 0x1c6   : > { %1101 = vmatprep.subr.mxu0 %v1079_v41  ;;  %1108 = vmatprep.subr.mxu1 %v1086_v42 }
 0x1c7   : > { %v317_v43 = vpop.f32.mrf.mxu0  ;;  %v398_v44 = vpop.f32.mrf.mxu1  ;;  %1102 = vmatpush3.msra.mxu0 %v1079_v41  ;;  %1109 = vmatpush3.msra.mxu1 %v1086_v42 }
 0x1c8   : > { %1103 = vmatprep.subr.mxu0 %v317_v43  ;;  %1110 = vmatprep.subr.mxu1 %v398_v44 }
 0x1c9   : > { %1104 = vmatpush3.msra.mxu0 %v317_v43  ;;  %1111 = vmatpush3.msra.mxu1 %v398_v44 }
 0x1ca   : > { %1106 = vmatmul.mubr.msk.f32.vlgmr.msra.gmra.mxu0 %vm244_vm0, %v1540_v21  ;;  %1113 = vmatmul.mubr.msk.f32.vlgmr.msra.gmra.mxu1 %vm244_vm0, %v1540_v21 }
 0x1cb   : > { %v1093_v45 = vpop.f32.mrf.mxu0  ;;  %v1100_v46 = vpop.f32.mrf.mxu1  ;;  %1119 = vmatprep.mubr.msk.f32.mxu0 %vm244_vm0, %v585_v40  ;;  %1126 = vmatprep.mubr.msk.f32.mxu1 %vm244_vm0, %v585_v40 }
 0x1cc   : > { %1115 = vmatprep.subr.mxu0 %v1093_v45  ;;  %1122 = vmatprep.subr.mxu1 %v1100_v46 }
 0x1cd   : > { %v479_v47 = vpop.f32.mrf.mxu0  ;;  %v560_v48 = vpop.f32.mrf.mxu1  ;;  %1116 = vmatpush3.msra.mxu0 %v1093_v45  ;;  %1123 = vmatpush3.msra.mxu1 %v1100_v46 }
 0x1ce   : > { %1117 = vmatprep.subr.mxu0 %v479_v47  ;;  %1124 = vmatprep.subr.mxu1 %v560_v48 }
 0x1cf   : > { %1118 = vmatpush3.msra.mxu0 %v479_v47  ;;  %1125 = vmatpush3.msra.mxu1 %v560_v48 }
 0x1d0   : > { %1120 = vmatmul.mubr.msk.f32.vlgmr.msra.gmra.mxu0 %vm244_vm0, %v1540_v21  ;;  %1127 = vmatmul.mubr.msk.f32.vlgmr.msra.gmra.mxu1 %vm244_vm0, %v1540_v21 }
 0x28a   : > { %v1107_v49 = vpop.f32.mrf.mxu0  ;;  %v1114_v50 = vpop.f32.mrf.mxu1 }
 0x28b   : > { %894 = vst.msk [vmem:[%s195_s25 + $0x8] sm:$0xff] %vm244_vm0, %v1107_v49  ;;  %896 = vst.msk [vmem:[%s195_s25 + $0x18] sm:$0xff] %vm244_vm0, %v1114_v50 }
 0x28c   : > { %v659_v51 = vpop.f32.mrf.mxu0  ;;  %v734_v52 = vpop.f32.mrf.mxu1 }
 0x28d   : > { %893 = vst.msk [vmem:[%s195_s25] sm:$0xff] %vm244_vm0, %v659_v51  ;;  %895 = vst.msk [vmem:[%s195_s25 + $0x10] sm:$0xff] %vm244_vm0, %v734_v52 }
 0x290   : > { %v1121_v53 = vpop.f32.mrf.mxu0  ;;  %v1128_v54 = vpop.f32.mrf.mxu1 }
 0x291   : > { %898 = vst.msk [vmem:[%s195_s25 + $0x28] sm:$0xff] %vm244_vm0, %v1121_v53  ;;  %900 = vst.msk [vmem:[%s195_s25 + $0x38] sm:$0xff] %vm244_vm0, %v1128_v54 }
 0x292   : > { %v809_v55 = vpop.f32.mrf.mxu0  ;;  %v884_v56 = vpop.f32.mrf.mxu1 }
 0x293   : > { %897 = vst.msk [vmem:[%s195_s25 + $0x20] sm:$0xff] %vm244_vm0, %v809_v55  ;;  %899 = vst.msk [vmem:[%s195_s25 + $0x30] sm:$0xff] %vm244_vm0, %v884_v56 }
 0x294   : > { %1274 = shalt.err (!%p1271_p0)
}
 0x295   : > { %s1275_s28 = scalar_lea.hbm %s1578_s17, 1024  ;;  %s1279_s7 = scalar_lea.hbm %s1627_s2, 2048 }
 0x296   : > { %p1276_p11 = scmp.ne.s32.totalorder %s1578_s17, %s1275_s28  ;;  %p1280_p6 = scmp.lt.s32.totalorder %s1578_s17, %s1627_s2 }
 0x297   : > { %p1281_p13 = scmp.lt.s32.totalorder %s1279_s7, %s1275_s28 }
 0x298   : > { %p1277_p12 = pnand %p1276_p11, %p1641_p1 }
 0x299   : > { %p1282_p3 = por %p1281_p13, %p1280_p6 }
 0x29a   : > { %p1278_p8 = pneg %p1277_p12 }
 0x29c   : > { %p1283_p7 = pnand %p1282_p3, %p1278_p8 }
 0x29e   : > { %1286 = shalt.err (!%p1283_p7)
}
 0x29f   : > { %s1339_s30 = smov 128   ;;  %s1340_s6 = smov 8  }
 0x2a0   : > { %1151 = dma.vmem_to_hbm [thread:$0]  (%p1641_p1), %s1573_s8, 1024, %s1578_s17, %s902_s13, %s1339_s30, %s1339_s30, %s1340_s6  }
 0x2a1 PF: > { %s930_s25 = sand.u32 1, %s1317_s9   ;;  %p1642_p10 = scmp.ne.s32.totalorder %s1633_s22, 0 }
 0x2a2   : > { %p1643_p2 = scmp.ge.s32.totalorder %s1329_s12, 2  ;;  %s931_s27 = scalar_lea.sflag [#allocation4], %s930_s25 }
 0x2a4   : > { %p1161_p4 = pnand %p1643_p2, %p1642_p10 }
 0x2a6   : > { %p1162_p5 = pneg %p1161_p4 }
 0x2a8   : > { %1312 = dma.done.wait (%p1162_p5), %s931_s27, 1024  }
 0x2a9   : > { %1314 = vsyncadd (%p1162_p5), %s931_s27, 4294966272  ;;  %p18_p9 = scmp.ge.s32.totalorder %s1381_s15, 4   ;;  %s1644_s9 = smov %s1321_s10 }
 0x2aa   : > { %s1645_s10 = smov %s1325_s11  ;;  %s1646_s11 = smov %s1393_s18 }
 0x2ab   : > { %s1647_s12 = smov %s1381_s15  ;;  %20 = sbr.rel (!%p18_p9) target bundleno = 7 (0x7), region = 86 }
 0x2b0   :  { %936 = vsyncpa [#allocation3], 1 }
 0x2b1   :  { %938 = vsyncpa [#allocation3 + $0x1], 1 }
 0x2b2   :  { %939 = vsyncpa [#allocation6], 1 }
 0x2b3   :  { %941 = vsyncpa [#allocation6 + $0x1], 1 }
 0x2b4   :  { %942 = vsyncpa [#allocation4], 1 }
 0x2b5   :  { %944 = vsyncpa [#allocation4 + $0x1], 1 }

</bundles_post_ra>
